<compile_context>
chip_gen: v5e
topology: v5e:2x2
jax: 0.10.0
libtpu: 0.0.40
codegen_flags: <defaults>
</compile_context>

<pallas_src>
import functools

import jax
import jax.numpy as jnp
from jax import lax
from jax.experimental import pallas as pl
from jax.experimental.pallas import tpu as pltpu


def _round_up(x, m):
    return ((x + m - 1) // m) * m


def _bert_embeddings_kernel(
    ids_ref,                       # scalar-prefetch: (Np,) int32 word ids in SMEM
    posid_ref, ttid_ref,           # (T, 1) int32 position / token-type ids (VMEM)
    table_ref,                     # (P+TV, H) concatenated pos+type table, VMEM resident
    gamma_ref, beta_ref,           # (1, H) LayerNorm params
    word_hbm_ref,                  # (V, H) word-embedding table left in HBM (pl.ANY)
    out_ref,                       # (T, H) output block
    wbuf, sem,                     # scratch: (T, H) VMEM gather buffer + DMA semaphore
    *, block_tokens, hidden, max_pos, type_vocab, eps,
):
    T, H, P = block_tokens, hidden, max_pos
    PC = max_pos + type_vocab
    i = pl.program_id(0)
    base = pl.multiple_of(i * T, T)

    # -- 1. issue T word-row gather DMAs HBM -> VMEM (8-way unrolled, one semaphore) --
    @pl.loop(0, T // 8)
    def _issue(jb):
        for u in range(8):                       # manual unroll; T is a multiple of 8
            j = jb * 8 + u
            row = ids_ref[base + j]
            pltpu.make_async_copy(word_hbm_ref.at[row], wbuf.at[j], sem.at[0]).start()

    # -- 2. while the gather is in flight: position + token-type embeddings via ONE
    #        fused one-hot matmul (T, P+TV) @ (P+TV, H) on the MXU --------------------
    col = lax.broadcasted_iota(jnp.int32, (T, PC), 1)
    onehot = jnp.logical_or(
        col == posid_ref[...],                   # columns [0, P): position one-hot
        col == ttid_ref[...] + P,                # columns [P, P+TV): token-type one-hot
    ).astype(jnp.float32)                        # exactly two 1s per row
    pt = jnp.dot(onehot, table_ref[...].astype(jnp.float32),
                 preferred_element_type=jnp.float32)            # pos_row + type_row

    # -- 3. single combined wait: every row copy signaled H*itemsize bytes on sem[0],
    #        so one wait sized for the whole (T, H) buffer consumes them all ----------
    pltpu.make_async_copy(wbuf, wbuf, sem.at[0]).wait()

    # -- 4. sum + LayerNorm (biased variance, matches torch.nn.LayerNorm) -------------
    x = wbuf[...].astype(jnp.float32) + pt
    inv_h = 1.0 / float(H)
    mean = jnp.sum(x, axis=-1, keepdims=True) * inv_h
    xc = x - mean
    var = jnp.sum(xc * xc, axis=-1, keepdims=True) * inv_h
    y = xc * lax.rsqrt(var + eps)
    y = y * gamma_ref[...].astype(jnp.float32) + beta_ref[...].astype(jnp.float32)

    # TODO(synk): training-mode dropout (hidden_dropout_prob) would use
    # pltpu.prng_seed / pltpu.stateful_bernoulli; eval mode is an identity.
    out_ref[...] = y.astype(out_ref.dtype)


def bert_embeddings(
    input_ids,            # [B, S] int32
    word_emb,             # [vocab_size, H]
    pos_emb,              # [max_position_embeddings, H]
    type_emb,             # [type_vocab_size, H]
    gamma,                # [H]
    beta,                 # [H]
    token_type_ids=None,  # [B, S] int32 or None
    position_ids=None,    # [B, S] int32 or None
    eps=1e-12,
    block_tokens=None,    # tokens per grid step (defaults to 256, multiple of 128)
    out_dtype=jnp.float32,  # set to jnp.bfloat16 if the consumer takes bf16 activations
):
    B, S = input_ids.shape
    _, H = word_emb.shape
    P = pos_emb.shape[0]
    TV = type_emb.shape[0]
    N = B * S

    if position_ids is None:
        position_ids = jnp.broadcast_to(
            jnp.arange(S, dtype=jnp.int32)[None, :], (B, S))
    if token_type_ids is None:
        token_type_ids = jnp.zeros_like(input_ids)

    # Token-block size: large enough to amortize per-step overhead, sublane-aligned.
    if block_tokens is None:
        block_tokens = 256
    T = min(block_tokens, _round_up(N, 8))
    T = _round_up(T, 8)
    Np = _round_up(N, T)
    num_blocks = Np // T
    pad = Np - N

    ids = input_ids.reshape(N).astype(jnp.int32)
    pos = position_ids.reshape(N).astype(jnp.int32)
    tts = token_type_ids.reshape(N).astype(jnp.int32)
    if pad:
        ids = jnp.pad(ids, (0, pad))     # padded tokens use row 0 of each table
        pos = jnp.pad(pos, (0, pad))
        tts = jnp.pad(tts, (0, pad))
    posid2 = pos.reshape(Np, 1)
    ttid2 = tts.reshape(Np, 1)
    gamma2 = gamma.reshape(1, H)
    beta2 = beta.reshape(1, H)

    # Concatenated position + token-type table; handled with one one-hot matmul.
    table = jnp.concatenate([pos_emb, type_emb], axis=0)          # (P+TV, H)
    PC = P + TV

    kernel = functools.partial(
        _bert_embeddings_kernel,
        block_tokens=T, hidden=H, max_pos=P, type_vocab=TV, eps=eps)

    # VMEM budget estimate (raise v5e's 16 MiB default; stay under v7x's 64 MiB).
    def _nbytes(dt):
        return jnp.dtype(dt).itemsize
    vmem_need = (
        2 * T * H * _nbytes(out_dtype)          # double-buffered output blocks
        + T * H * _nbytes(word_emb.dtype)       # gather scratch
        + 2 * PC * H * _nbytes(table.dtype)     # resident pos+type table (2 bufs)
        + 2 * T * PC * 4                        # one-hot / iota temporaries
        + 6 * T * H * 4                         # f32 LayerNorm temporaries
        + 8 * T * 4                             # id blocks
    )
    vmem_limit = int(min(64 * 1024 * 1024, max(32 * 1024 * 1024, 2 * vmem_need)))

    grid_spec = pltpu.PrefetchScalarGridSpec(
        num_scalar_prefetch=1,
        grid=(num_blocks,),
        in_specs=[
            pl.BlockSpec((T, 1), lambda i, ids: (i, 0)),     # position ids (per block)
            pl.BlockSpec((T, 1), lambda i, ids: (i, 0)),     # token-type ids (per block)
            pl.BlockSpec((PC, H), lambda i, ids: (0, 0)),    # pos+type table, VMEM resident
            pl.BlockSpec((1, H), lambda i, ids: (0, 0)),     # gamma
            pl.BlockSpec((1, H), lambda i, ids: (0, 0)),     # beta
            pl.BlockSpec(memory_space=pl.ANY),               # word table stays in HBM
        ],
        out_specs=pl.BlockSpec((T, H), lambda i, ids: (i, 0)),
        scratch_shapes=[
            pltpu.VMEM((T, H), word_emb.dtype),              # gathered word rows
            pltpu.SemaphoreType.DMA((1,)),                   # shared gather semaphore
        ],
    )

    out_flat = pl.pallas_call(
        kernel,
        out_shape=jax.ShapeDtypeStruct((Np, H), out_dtype),
        grid_spec=grid_spec,
        compiler_params=pltpu.CompilerParams(
            dimension_semantics=("parallel",),
            vmem_limit_bytes=vmem_limit),
    )(ids, posid2, ttid2, table, gamma2, beta2, word_emb)

    return out_flat[:N].reshape(B, S, H)


def _reference(input_ids, word_emb, pos_emb, type_emb, gamma, beta, eps):
    B, S = input_ids.shape
    position_ids = jnp.broadcast_to(jnp.arange(S, dtype=jnp.int32)[None, :], (B, S))
    token_type_ids = jnp.zeros_like(input_ids)
    x = word_emb[input_ids] + pos_emb[position_ids] + type_emb[token_type_ids]
    mean = jnp.mean(x, axis=-1, keepdims=True)
    var = jnp.mean((x - mean) ** 2, axis=-1, keepdims=True)
    return (x - mean) * jax.lax.rsqrt(var + eps) * gamma + beta


if __name__ == "__main__":
    # Small "config": vocab=100, hidden=128, max_pos=64, type_vocab=2, pad_token_id=0
    vocab_size = 100
    hidden_size = 128
    max_position_embeddings = 64
    type_vocab_size = 2
    layer_norm_eps = 1e-12
    B, S = 2, 8

    key = jax.random.PRNGKey(0)
    k_w, k_p, k_t, k_ids = jax.random.split(key, 4)

    word_emb = 0.02 * jax.random.normal(k_w, (vocab_size, hidden_size), jnp.float32)
    # nn.Embedding(padding_idx=0): row 0 initialized to zeros
    word_emb = word_emb.at[0].set(0.0)
    pos_emb = 0.02 * jax.random.normal(k_p, (max_position_embeddings, hidden_size), jnp.float32)
    type_emb = 0.02 * jax.random.normal(k_t, (type_vocab_size, hidden_size), jnp.float32)
    gamma = jnp.ones((hidden_size,), jnp.float32)
    beta = jnp.zeros((hidden_size,), jnp.float32)

    input_ids = jax.random.randint(k_ids, (B, S), 0, vocab_size, dtype=jnp.int32)

    out = bert_embeddings(
        input_ids, word_emb, pos_emb, type_emb, gamma, beta, eps=layer_norm_eps)
    out = jax.block_until_ready(out)

    ref = _reference(input_ids, word_emb, pos_emb, type_emb, gamma, beta, layer_norm_eps)
    assert out.shape == (B, S, hidden_size)
    assert jnp.max(jnp.abs(out - ref)) < 5e-4, "mismatch vs. pure-JAX reference"

    print("KERNEL_OK")
</pallas_src>

<mosaic_0001>
module attributes {stable_mosaic.version = 11 : i64} {
  func.func @_bert_embeddings_kernel(%arg0: i32, %arg1: memref<16xi32, #tpu.memory_space<smem>>, %arg2: memref<16x1xi32, #tpu.memory_space<vmem>>, %arg3: memref<16x1xi32, #tpu.memory_space<vmem>>, %arg4: memref<66x128xf32, #tpu.memory_space<vmem>>, %arg5: memref<1x128xf32, #tpu.memory_space<vmem>>, %arg6: memref<1x128xf32, #tpu.memory_space<vmem>>, %arg7: memref<100x128xf32, #tpu.memory_space<any>>, %arg8: memref<16x128xf32, #tpu.memory_space<vmem>>, %arg9: memref<16x128xf32, #tpu.memory_space<vmem>>, %arg10: memref<1x!tpu.dma_semaphore, #tpu.memory_space<semaphore_mem>>) attributes {dimension_semantics = [#tpu.dimension_semantics<parallel>], iteration_bounds = array<i64: 1>, scalar_prefetch = 1 : i64, scratch_operands = 2 : i64, tpu.core_type = #tpu.core_type<tc>, window_params = [{transform_indices = @transform_0, window_bounds = array<i64: 16, 1>}, {transform_indices = @transform_1, window_bounds = array<i64: 16, 1>}, {pipeline_mode = #tpu.pipeline_mode<synchronous>, transform_indices = @transform_2, window_bounds = array<i64: 66, 128>}, {pipeline_mode = #tpu.pipeline_mode<synchronous>, transform_indices = @transform_3, window_bounds = array<i64: 1, 128>}, {pipeline_mode = #tpu.pipeline_mode<synchronous>, transform_indices = @transform_4, window_bounds = array<i64: 1, 128>}, {}, {transform_indices = @transform_6, window_bounds = array<i64: 16, 128>}]} {
    %c16_i32 = arith.constant 16 : i32
    %0 = arith.muli %arg0, %c16_i32 : i32
    %1 = tpu.assume_multiple %0, 16 : i32
    %c0_i32 = arith.constant 0 : i32
    %c2_i32 = arith.constant 2 : i32
    %2 = arith.addi %c0_i32, %c2_i32 : i32
    %c1_i32 = arith.constant 1 : i32
    scf.for %arg11 = %c0_i32 to %2 step %c1_i32  : i32 {
      %c1_i32_20 = arith.constant 1 : i32
      %44 = arith.muli %arg11, %c1_i32_20 : i32
      %c0_i32_21 = arith.constant 0 : i32
      %45 = arith.addi %c0_i32_21, %44 : i32
      %c8_i32 = arith.constant 8 : i32
      %46 = arith.muli %45, %c8_i32 : i32
      %c0_i32_22 = arith.constant 0 : i32
      %47 = arith.addi %46, %c0_i32_22 : i32
      %48 = arith.addi %1, %47 : i32
      %49 = arith.index_cast %48 : i32 to index
      %50 = memref.load %arg1[%49] : memref<16xi32, #tpu.memory_space<smem>>
      %c0_i32_23 = arith.constant 0 : i32
      %c0_i32_24 = arith.constant 0 : i32
      %51 = tpu.memref_slice %arg7[%50, %c0_i32_24] : memref<100x128xf32, #tpu.memory_space<any>> -> memref<1x128xf32, #tpu.memory_space<any>>
      %52 = tpu.memref_squeeze %51 : memref<1x128xf32, #tpu.memory_space<any>> -> memref<128xf32, #tpu.memory_space<any>>
      %c0_i32_25 = arith.constant 0 : i32
      %53 = tpu.memref_slice %arg9[%47, %c0_i32_25] : memref<16x128xf32, #tpu.memory_space<vmem>> -> memref<1x128xf32, #tpu.memory_space<vmem>>
      %54 = tpu.memref_squeeze %53 : memref<1x128xf32, #tpu.memory_space<vmem>> -> memref<128xf32, #tpu.memory_space<vmem>>
      %55 = tpu.memref_slice %arg10[%c0_i32_23] : memref<1x!tpu.dma_semaphore, #tpu.memory_space<semaphore_mem>> -> memref<1x!tpu.dma_semaphore, #tpu.memory_space<semaphore_mem>>
      %56 = tpu.memref_squeeze %55 : memref<1x!tpu.dma_semaphore, #tpu.memory_space<semaphore_mem>> -> memref<!tpu.dma_semaphore, #tpu.memory_space<semaphore_mem>>
      tpu.enqueue_dma source(%52 : memref<128xf32, #tpu.memory_space<any>>) target(%54 : memref<128xf32, #tpu.memory_space<vmem>>) target_semaphore(%56 : memref<!tpu.dma_semaphore, #tpu.memory_space<semaphore_mem>>)
      %c8_i32_26 = arith.constant 8 : i32
      %57 = arith.muli %45, %c8_i32_26 : i32
      %c1_i32_27 = arith.constant 1 : i32
      %58 = arith.addi %57, %c1_i32_27 : i32
      %59 = arith.addi %1, %58 : i32
      %60 = arith.index_cast %59 : i32 to index
      %61 = memref.load %arg1[%60] : memref<16xi32, #tpu.memory_space<smem>>
      %c0_i32_28 = arith.constant 0 : i32
      %c0_i32_29 = arith.constant 0 : i32
      %62 = tpu.memref_slice %arg7[%61, %c0_i32_29] : memref<100x128xf32, #tpu.memory_space<any>> -> memref<1x128xf32, #tpu.memory_space<any>>
      %63 = tpu.memref_squeeze %62 : memref<1x128xf32, #tpu.memory_space<any>> -> memref<128xf32, #tpu.memory_space<any>>
      %c0_i32_30 = arith.constant 0 : i32
      %64 = tpu.memref_slice %arg9[%58, %c0_i32_30] : memref<16x128xf32, #tpu.memory_space<vmem>> -> memref<1x128xf32, #tpu.memory_space<vmem>>
      %65 = tpu.memref_squeeze %64 : memref<1x128xf32, #tpu.memory_space<vmem>> -> memref<128xf32, #tpu.memory_space<vmem>>
      %66 = tpu.memref_slice %arg10[%c0_i32_28] : memref<1x!tpu.dma_semaphore, #tpu.memory_space<semaphore_mem>> -> memref<1x!tpu.dma_semaphore, #tpu.memory_space<semaphore_mem>>
      %67 = tpu.memref_squeeze %66 : memref<1x!tpu.dma_semaphore, #tpu.memory_space<semaphore_mem>> -> memref<!tpu.dma_semaphore, #tpu.memory_space<semaphore_mem>>
      tpu.enqueue_dma source(%63 : memref<128xf32, #tpu.memory_space<any>>) target(%65 : memref<128xf32, #tpu.memory_space<vmem>>) target_semaphore(%67 : memref<!tpu.dma_semaphore, #tpu.memory_space<semaphore_mem>>)
      %c8_i32_31 = arith.constant 8 : i32
      %68 = arith.muli %45, %c8_i32_31 : i32
      %c2_i32_32 = arith.constant 2 : i32
      %69 = arith.addi %68, %c2_i32_32 : i32
      %70 = arith.addi %1, %69 : i32
      %71 = arith.index_cast %70 : i32 to index
      %72 = memref.load %arg1[%71] : memref<16xi32, #tpu.memory_space<smem>>
      %c0_i32_33 = arith.constant 0 : i32
      %c0_i32_34 = arith.constant 0 : i32
      %73 = tpu.memref_slice %arg7[%72, %c0_i32_34] : memref<100x128xf32, #tpu.memory_space<any>> -> memref<1x128xf32, #tpu.memory_space<any>>
      %74 = tpu.memref_squeeze %73 : memref<1x128xf32, #tpu.memory_space<any>> -> memref<128xf32, #tpu.memory_space<any>>
      %c0_i32_35 = arith.constant 0 : i32
      %75 = tpu.memref_slice %arg9[%69, %c0_i32_35] : memref<16x128xf32, #tpu.memory_space<vmem>> -> memref<1x128xf32, #tpu.memory_space<vmem>>
      %76 = tpu.memref_squeeze %75 : memref<1x128xf32, #tpu.memory_space<vmem>> -> memref<128xf32, #tpu.memory_space<vmem>>
      %77 = tpu.memref_slice %arg10[%c0_i32_33] : memref<1x!tpu.dma_semaphore, #tpu.memory_space<semaphore_mem>> -> memref<1x!tpu.dma_semaphore, #tpu.memory_space<semaphore_mem>>
      %78 = tpu.memref_squeeze %77 : memref<1x!tpu.dma_semaphore, #tpu.memory_space<semaphore_mem>> -> memref<!tpu.dma_semaphore, #tpu.memory_space<semaphore_mem>>
      tpu.enqueue_dma source(%74 : memref<128xf32, #tpu.memory_space<any>>) target(%76 : memref<128xf32, #tpu.memory_space<vmem>>) target_semaphore(%78 : memref<!tpu.dma_semaphore, #tpu.memory_space<semaphore_mem>>)
      %c8_i32_36 = arith.constant 8 : i32
      %79 = arith.muli %45, %c8_i32_36 : i32
      %c3_i32 = arith.constant 3 : i32
      %80 = arith.addi %79, %c3_i32 : i32
      %81 = arith.addi %1, %80 : i32
      %82 = arith.index_cast %81 : i32 to index
      %83 = memref.load %arg1[%82] : memref<16xi32, #tpu.memory_space<smem>>
      %c0_i32_37 = arith.constant 0 : i32
      %c0_i32_38 = arith.constant 0 : i32
      %84 = tpu.memref_slice %arg7[%83, %c0_i32_38] : memref<100x128xf32, #tpu.memory_space<any>> -> memref<1x128xf32, #tpu.memory_space<any>>
      %85 = tpu.memref_squeeze %84 : memref<1x128xf32, #tpu.memory_space<any>> -> memref<128xf32, #tpu.memory_space<any>>
      %c0_i32_39 = arith.constant 0 : i32
      %86 = tpu.memref_slice %arg9[%80, %c0_i32_39] : memref<16x128xf32, #tpu.memory_space<vmem>> -> memref<1x128xf32, #tpu.memory_space<vmem>>
      %87 = tpu.memref_squeeze %86 : memref<1x128xf32, #tpu.memory_space<vmem>> -> memref<128xf32, #tpu.memory_space<vmem>>
      %88 = tpu.memref_slice %arg10[%c0_i32_37] : memref<1x!tpu.dma_semaphore, #tpu.memory_space<semaphore_mem>> -> memref<1x!tpu.dma_semaphore, #tpu.memory_space<semaphore_mem>>
      %89 = tpu.memref_squeeze %88 : memref<1x!tpu.dma_semaphore, #tpu.memory_space<semaphore_mem>> -> memref<!tpu.dma_semaphore, #tpu.memory_space<semaphore_mem>>
      tpu.enqueue_dma source(%85 : memref<128xf32, #tpu.memory_space<any>>) target(%87 : memref<128xf32, #tpu.memory_space<vmem>>) target_semaphore(%89 : memref<!tpu.dma_semaphore, #tpu.memory_space<semaphore_mem>>)
      %c8_i32_40 = arith.constant 8 : i32
      %90 = arith.muli %45, %c8_i32_40 : i32
      %c4_i32 = arith.constant 4 : i32
      %91 = arith.addi %90, %c4_i32 : i32
      %92 = arith.addi %1, %91 : i32
      %93 = arith.index_cast %92 : i32 to index
      %94 = memref.load %arg1[%93] : memref<16xi32, #tpu.memory_space<smem>>
      %c0_i32_41 = arith.constant 0 : i32
      %c0_i32_42 = arith.constant 0 : i32
      %95 = tpu.memref_slice %arg7[%94, %c0_i32_42] : memref<100x128xf32, #tpu.memory_space<any>> -> memref<1x128xf32, #tpu.memory_space<any>>
      %96 = tpu.memref_squeeze %95 : memref<1x128xf32, #tpu.memory_space<any>> -> memref<128xf32, #tpu.memory_space<any>>
      %c0_i32_43 = arith.constant 0 : i32
      %97 = tpu.memref_slice %arg9[%91, %c0_i32_43] : memref<16x128xf32, #tpu.memory_space<vmem>> -> memref<1x128xf32, #tpu.memory_space<vmem>>
      %98 = tpu.memref_squeeze %97 : memref<1x128xf32, #tpu.memory_space<vmem>> -> memref<128xf32, #tpu.memory_space<vmem>>
      %99 = tpu.memref_slice %arg10[%c0_i32_41] : memref<1x!tpu.dma_semaphore, #tpu.memory_space<semaphore_mem>> -> memref<1x!tpu.dma_semaphore, #tpu.memory_space<semaphore_mem>>
      %100 = tpu.memref_squeeze %99 : memref<1x!tpu.dma_semaphore, #tpu.memory_space<semaphore_mem>> -> memref<!tpu.dma_semaphore, #tpu.memory_space<semaphore_mem>>
      tpu.enqueue_dma source(%96 : memref<128xf32, #tpu.memory_space<any>>) target(%98 : memref<128xf32, #tpu.memory_space<vmem>>) target_semaphore(%100 : memref<!tpu.dma_semaphore, #tpu.memory_space<semaphore_mem>>)
      %c8_i32_44 = arith.constant 8 : i32
      %101 = arith.muli %45, %c8_i32_44 : i32
      %c5_i32 = arith.constant 5 : i32
      %102 = arith.addi %101, %c5_i32 : i32
      %103 = arith.addi %1, %102 : i32
      %104 = arith.index_cast %103 : i32 to index
      %105 = memref.load %arg1[%104] : memref<16xi32, #tpu.memory_space<smem>>
      %c0_i32_45 = arith.constant 0 : i32
      %c0_i32_46 = arith.constant 0 : i32
      %106 = tpu.memref_slice %arg7[%105, %c0_i32_46] : memref<100x128xf32, #tpu.memory_space<any>> -> memref<1x128xf32, #tpu.memory_space<any>>
      %107 = tpu.memref_squeeze %106 : memref<1x128xf32, #tpu.memory_space<any>> -> memref<128xf32, #tpu.memory_space<any>>
      %c0_i32_47 = arith.constant 0 : i32
      %108 = tpu.memref_slice %arg9[%102, %c0_i32_47] : memref<16x128xf32, #tpu.memory_space<vmem>> -> memref<1x128xf32, #tpu.memory_space<vmem>>
      %109 = tpu.memref_squeeze %108 : memref<1x128xf32, #tpu.memory_space<vmem>> -> memref<128xf32, #tpu.memory_space<vmem>>
      %110 = tpu.memref_slice %arg10[%c0_i32_45] : memref<1x!tpu.dma_semaphore, #tpu.memory_space<semaphore_mem>> -> memref<1x!tpu.dma_semaphore, #tpu.memory_space<semaphore_mem>>
      %111 = tpu.memref_squeeze %110 : memref<1x!tpu.dma_semaphore, #tpu.memory_space<semaphore_mem>> -> memref<!tpu.dma_semaphore, #tpu.memory_space<semaphore_mem>>
      tpu.enqueue_dma source(%107 : memref<128xf32, #tpu.memory_space<any>>) target(%109 : memref<128xf32, #tpu.memory_space<vmem>>) target_semaphore(%111 : memref<!tpu.dma_semaphore, #tpu.memory_space<semaphore_mem>>)
      %c8_i32_48 = arith.constant 8 : i32
      %112 = arith.muli %45, %c8_i32_48 : i32
      %c6_i32 = arith.constant 6 : i32
      %113 = arith.addi %112, %c6_i32 : i32
      %114 = arith.addi %1, %113 : i32
      %115 = arith.index_cast %114 : i32 to index
      %116 = memref.load %arg1[%115] : memref<16xi32, #tpu.memory_space<smem>>
      %c0_i32_49 = arith.constant 0 : i32
      %c0_i32_50 = arith.constant 0 : i32
      %117 = tpu.memref_slice %arg7[%116, %c0_i32_50] : memref<100x128xf32, #tpu.memory_space<any>> -> memref<1x128xf32, #tpu.memory_space<any>>
      %118 = tpu.memref_squeeze %117 : memref<1x128xf32, #tpu.memory_space<any>> -> memref<128xf32, #tpu.memory_space<any>>
      %c0_i32_51 = arith.constant 0 : i32
      %119 = tpu.memref_slice %arg9[%113, %c0_i32_51] : memref<16x128xf32, #tpu.memory_space<vmem>> -> memref<1x128xf32, #tpu.memory_space<vmem>>
      %120 = tpu.memref_squeeze %119 : memref<1x128xf32, #tpu.memory_space<vmem>> -> memref<128xf32, #tpu.memory_space<vmem>>
      %121 = tpu.memref_slice %arg10[%c0_i32_49] : memref<1x!tpu.dma_semaphore, #tpu.memory_space<semaphore_mem>> -> memref<1x!tpu.dma_semaphore, #tpu.memory_space<semaphore_mem>>
      %122 = tpu.memref_squeeze %121 : memref<1x!tpu.dma_semaphore, #tpu.memory_space<semaphore_mem>> -> memref<!tpu.dma_semaphore, #tpu.memory_space<semaphore_mem>>
      tpu.enqueue_dma source(%118 : memref<128xf32, #tpu.memory_space<any>>) target(%120 : memref<128xf32, #tpu.memory_space<vmem>>) target_semaphore(%122 : memref<!tpu.dma_semaphore, #tpu.memory_space<semaphore_mem>>)
      %c8_i32_52 = arith.constant 8 : i32
      %123 = arith.muli %45, %c8_i32_52 : i32
      %c7_i32 = arith.constant 7 : i32
      %124 = arith.addi %123, %c7_i32 : i32
      %125 = arith.addi %1, %124 : i32
      %126 = arith.index_cast %125 : i32 to index
      %127 = memref.load %arg1[%126] : memref<16xi32, #tpu.memory_space<smem>>
      %c0_i32_53 = arith.constant 0 : i32
      %c0_i32_54 = arith.constant 0 : i32
      %128 = tpu.memref_slice %arg7[%127, %c0_i32_54] : memref<100x128xf32, #tpu.memory_space<any>> -> memref<1x128xf32, #tpu.memory_space<any>>
      %129 = tpu.memref_squeeze %128 : memref<1x128xf32, #tpu.memory_space<any>> -> memref<128xf32, #tpu.memory_space<any>>
      %c0_i32_55 = arith.constant 0 : i32
      %130 = tpu.memref_slice %arg9[%124, %c0_i32_55] : memref<16x128xf32, #tpu.memory_space<vmem>> -> memref<1x128xf32, #tpu.memory_space<vmem>>
      %131 = tpu.memref_squeeze %130 : memref<1x128xf32, #tpu.memory_space<vmem>> -> memref<128xf32, #tpu.memory_space<vmem>>
      %132 = tpu.memref_slice %arg10[%c0_i32_53] : memref<1x!tpu.dma_semaphore, #tpu.memory_space<semaphore_mem>> -> memref<1x!tpu.dma_semaphore, #tpu.memory_space<semaphore_mem>>
      %133 = tpu.memref_squeeze %132 : memref<1x!tpu.dma_semaphore, #tpu.memory_space<semaphore_mem>> -> memref<!tpu.dma_semaphore, #tpu.memory_space<semaphore_mem>>
      tpu.enqueue_dma source(%129 : memref<128xf32, #tpu.memory_space<any>>) target(%131 : memref<128xf32, #tpu.memory_space<vmem>>) target_semaphore(%133 : memref<!tpu.dma_semaphore, #tpu.memory_space<semaphore_mem>>)
    }
    %c2_i32_0 = arith.constant 2 : i32
    %3 = tpu.iota {dimensions = array<i32: 1>} : vector<16x66xi32>
    %c0 = arith.constant 0 : index
    %c0_1 = arith.constant 0 : index
    %4 = vector.load %arg2[%c0, %c0_1] : memref<16x1xi32, #tpu.memory_space<vmem>>, vector<16x1xi32>
    %5 = vector.broadcast %4 : vector<16x1xi32> to vector<16x66xi32>
    %6 = arith.cmpi eq, %3, %5 : vector<16x66xi32>
    %c0_2 = arith.constant 0 : index
    %c0_3 = arith.constant 0 : index
    %7 = vector.load %arg3[%c0_2, %c0_3] : memref<16x1xi32, #tpu.memory_space<vmem>>, vector<16x1xi32>
    %c64_i32 = arith.constant 64 : i32
    %8 = vector.broadcast %c64_i32 : i32 to vector<16x1xi32>
    %9 = arith.addi %7, %8 : vector<16x1xi32>
    %10 = vector.broadcast %9 : vector<16x1xi32> to vector<16x66xi32>
    %11 = arith.cmpi eq, %3, %10 : vector<16x66xi32>
    %12 = arith.ori %6, %11 : vector<16x66xi1>
    %13 = arith.extui %12 : vector<16x66xi1> to vector<16x66xi32>
    %14 = arith.sitofp %13 : vector<16x66xi32> to vector<16x66xf32>
    %c0_4 = arith.constant 0 : index
    %c0_5 = arith.constant 0 : index
    %15 = vector.load %arg4[%c0_4, %c0_5] : memref<66x128xf32, #tpu.memory_space<vmem>>, vector<66x128xf32>
    %cst = arith.constant dense<0.000000e+00> : vector<16x128xf32>
    %16 = tpu.matmul %14, %15, %cst {dimension_numbers = #tpu.dot_dimension_numbers<[1], [0], [0], [1], [0, 0, 1, 1], [], []>} : vector<16x66xf32>, vector<66x128xf32>, vector<16x128xf32> -> vector<16x128xf32>
    %c0_i32_6 = arith.constant 0 : i32
    %17 = tpu.memref_slice %arg10[%c0_i32_6] : memref<1x!tpu.dma_semaphore, #tpu.memory_space<semaphore_mem>> -> memref<1x!tpu.dma_semaphore, #tpu.memory_space<semaphore_mem>>
    %18 = tpu.memref_squeeze %17 : memref<1x!tpu.dma_semaphore, #tpu.memory_space<semaphore_mem>> -> memref<!tpu.dma_semaphore, #tpu.memory_space<semaphore_mem>>
    tpu.wait_dma2 semaphore(%18 : memref<!tpu.dma_semaphore, #tpu.memory_space<semaphore_mem>>) src(%arg9 : memref<16x128xf32, #tpu.memory_space<vmem>>) dst(%arg9 : memref<16x128xf32, #tpu.memory_space<vmem>>)
    %c0_7 = arith.constant 0 : index
    %c0_8 = arith.constant 0 : index
    %19 = vector.load %arg9[%c0_7, %c0_8] : memref<16x128xf32, #tpu.memory_space<vmem>>, vector<16x128xf32>
    %20 = arith.addf %19, %16 : vector<16x128xf32>
    %cst_9 = arith.constant dense<0.000000e+00> : vector<16xf32>
    %21 = vector.multi_reduction <add>, %20, %cst_9 [1] : vector<16x128xf32> to vector<16xf32>
    %22 = vector.shape_cast %21 : vector<16xf32> to vector<16x1xf32>
    %cst_10 = arith.constant 7.812500e-03 : f32
    %23 = vector.broadcast %cst_10 : f32 to vector<16x1xf32>
    %24 = arith.mulf %22, %23 : vector<16x1xf32>
    %25 = vector.broadcast %24 : vector<16x1xf32> to vector<16x128xf32>
    %26 = arith.subf %20, %25 : vector<16x128xf32>
    %27 = arith.mulf %26, %26 : vector<16x128xf32>
    %cst_11 = arith.constant dense<0.000000e+00> : vector<16xf32>
    %28 = vector.multi_reduction <add>, %27, %cst_11 [1] : vector<16x128xf32> to vector<16xf32>
    %29 = vector.shape_cast %28 : vector<16xf32> to vector<16x1xf32>
    %cst_12 = arith.constant 7.812500e-03 : f32
    %30 = vector.broadcast %cst_12 : f32 to vector<16x1xf32>
    %31 = arith.mulf %29, %30 : vector<16x1xf32>
    %cst_13 = arith.constant 9.99999996E-13 : f32
    %32 = vector.broadcast %cst_13 : f32 to vector<16x1xf32>
    %33 = arith.addf %31, %32 : vector<16x1xf32>
    %34 = math.rsqrt %33 : vector<16x1xf32>
    %35 = vector.broadcast %34 : vector<16x1xf32> to vector<16x128xf32>
    %36 = arith.mulf %26, %35 : vector<16x128xf32>
    %c0_14 = arith.constant 0 : index
    %c0_15 = arith.constant 0 : index
    %37 = vector.load %arg5[%c0_14, %c0_15] : memref<1x128xf32, #tpu.memory_space<vmem>>, vector<1x128xf32>
    %38 = vector.broadcast %37 : vector<1x128xf32> to vector<16x128xf32>
    %39 = arith.mulf %36, %38 : vector<16x128xf32>
    %c0_16 = arith.constant 0 : index
    %c0_17 = arith.constant 0 : index
    %40 = vector.load %arg6[%c0_16, %c0_17] : memref<1x128xf32, #tpu.memory_space<vmem>>, vector<1x128xf32>
    %41 = vector.broadcast %40 : vector<1x128xf32> to vector<16x128xf32>
    %42 = arith.addf %39, %41 : vector<16x128xf32>
    %c0_18 = arith.constant 0 : index
    %c0_19 = arith.constant 0 : index
    %43 = vector.load %arg8[%c0_18, %c0_19] : memref<16x128xf32, #tpu.memory_space<vmem>>, vector<16x128xf32>
    tpu.vector_store %arg8[%c0_18, %c0_19], %42 {strides = array<i32>} : memref<16x128xf32, #tpu.memory_space<vmem>>, vector<16x128xf32>,
    return
  }
  func.func @transform_0(%arg0: i32, %arg1: memref<16xi32, #tpu.memory_space<smem>>) -> (i32, i32) {
    %c0_i32 = arith.constant 0 : i32
    %c0_i32_0 = arith.constant 0 : i32
    return %arg0, %c0_i32 : i32, i32
  }
  func.func @transform_1(%arg0: i32, %arg1: memref<16xi32, #tpu.memory_space<smem>>) -> (i32, i32) {
    %c0_i32 = arith.constant 0 : i32
    %c0_i32_0 = arith.constant 0 : i32
    return %arg0, %c0_i32 : i32, i32
  }
  func.func @transform_2(%arg0: i32, %arg1: memref<16xi32, #tpu.memory_space<smem>>) -> (i32, i32) {
    %c0_i32 = arith.constant 0 : i32
    %c0_i32_0 = arith.constant 0 : i32
    %c0_i32_1 = arith.constant 0 : i32
    return %c0_i32, %c0_i32_0 : i32, i32
  }
  func.func @transform_3(%arg0: i32, %arg1: memref<16xi32, #tpu.memory_space<smem>>) -> (i32, i32) {
    %c0_i32 = arith.constant 0 : i32
    %c0_i32_0 = arith.constant 0 : i32
    %c0_i32_1 = arith.constant 0 : i32
    return %c0_i32, %c0_i32_0 : i32, i32
  }
  func.func @transform_4(%arg0: i32, %arg1: memref<16xi32, #tpu.memory_space<smem>>) -> (i32, i32) {
    %c0_i32 = arith.constant 0 : i32
    %c0_i32_0 = arith.constant 0 : i32
    %c0_i32_1 = arith.constant 0 : i32
    return %c0_i32, %c0_i32_0 : i32, i32
  }
  func.func @transform_6(%arg0: i32, %arg1: memref<16xi32, #tpu.memory_space<smem>>) -> (i32, i32) {
    %c0_i32 = arith.constant 0 : i32
    %c0_i32_0 = arith.constant 0 : i32
    return %arg0, %c0_i32 : i32, i32
  }
}

</mosaic_0001>

<bundles_post_ra>
// kernel: tpu_custom_call.1
= control target key start
LH: loop header
LB: loop body
LE: loop exit
PB: predicated region body
PF: predicated region fallthrough
CT: control target
= control target key end

     0   :  { %s707_s27 = smov [#allocation5]   ;;  %s956_s0 = inlined_call_operand.vmem [shape: s32[16], index: 0, kind: input, shape index: {}]   ;;  %s957_s1 = inlined_call_operand.vmem [shape: s32[16,1], index: 1, kind: input, shape index: {}]   ;;  %s958_s2 = inlined_call_operand.vmem [shape: s32[16,1], index: 2, kind: input, shape index: {}]   ;;  %s959_s3 = inlined_call_operand.hbm [shape: f32[66,128], index: 3, kind: input, shape index: {}]   ;;  %s960_s4 = inlined_call_operand.vmem [shape: f32[1,128], index: 4, kind: input, shape index: {}]   ;;  %s961_s5 = inlined_call_operand.vmem [shape: f32[1,128], index: 5, kind: input, shape index: {}]   ;;  %s962_s6 = inlined_call_operand.hbm [shape: f32[100,128], index: 6, kind: input, shape index: {}]   ;;  %s963_s7 = inlined_call_operand.hbm [shape: f32[16,128], index: 7, kind: output, shape index: {}]  }
   0x1   :  { %s13_s26 = sshll.u32 %s956_s0, 4  ;;  %s14_s26 = int_to_ptr.vmem [resolvable:$true] %s13_s26 }
   0x2   :  { %16 = dma.vmem_to_smem %s14_s26, 16, %s707_s27, [#allocation4] }
   0x3   :  { %695 = dma.done.wait [#allocation4], 16 }
   0x4   :  { %696 = vsyncadd [#allocation4], 4294967280 }
   0x5   :  { %19 = sfence }
   0x6   :  { %20 = vsyncpa [#allocation7], 0 }
   0x7   :  { %21 = vsyncpa [#allocation8], 0  ;;  %s30_s30 = sshll.u32 %s959_s3, 4  ;;  %s708_s8 = smov [#allocation6]   ;;  %s31_s30 = int_to_ptr.hbm [resolvable:$true] %s30_s30 }
   0x8   :  { %s32_s9 = sshll.u32 %s708_s8, 4  ;;  %s709_s10 = smov 128   ;;  %s33_s9 = int_to_ptr.vmem [resolvable:$true] %s32_s9 }
   0x9   :  { %s710_s11 = smov 8  }
   0xa   :  { %38 = dma.hbm_to_vmem [thread:$0]  %s31_s30, 1152, %s33_s9, [#allocation7], %s709_s10, %s709_s10, %s710_s11  }
   0xb   :  { %697 = dma.done.wait [#allocation7], 1152  }
   0xc   :  { %698 = vsyncadd [#allocation7], 4294966144  ;;  %s764_s0 = smov 0  }
   0xd LB: > { %s770_s3 = sshll.u32 %s705_s0, 3  ;;  %s705_s0 = sphi %s764_s0, %s53_s0  }
   0xe   : > { %s56_s12 = sld [smem:[#allocation5 + %s770_s3]]  ;;  %s774_s13 = scalar_lea.vmem [#allocation2], %s770_s3 }
   0xf   : > { %s68_s14 = sshll.u32 %s774_s13, 4  ;;  %s72_s15 = sadd.s32 1, %s770_s3  ;;  %s778_s14 = int_to_ptr.vmem [resolvable:$true] %s68_s14 }
  0x10   : > { %s780_s16 = sld [smem:[#allocation5 + %s72_s15]]  ;;  %s363_s17 = scalar_lea.vmem %s774_s13, 1 [#allocation2] }
  0x11   : > { %s90_s18 = sadd.s32 2, %s770_s3  ;;  %s784_s19 = sshll.u32 %s363_s17, 4  ;;  %s87_s19 = int_to_ptr.vmem [resolvable:$true] %s784_s19 }
  0x12   : > { %s786_s20 = sld [smem:[#allocation5 + %s90_s18]]  ;;  %s367_s21 = scalar_lea.vmem %s774_s13, 2 [#allocation2] }
  0x13   : > { %s793_s25 = sshll.u32 %s367_s21, 4  ;;  %s803_s17 = scalar_lea.hbm %s962_s6, 104  ;;  %s105_s25 = int_to_ptr.vmem [resolvable:$true] %s793_s25 }
  0x14   : > { %s57_s24 = scalar_lea.hbm %s962_s6, %s56_s12 }
  0x15   : > { %s66_s26 = sshll.u32 %s57_s24, 4  ;;  %s67_s26 = int_to_ptr.hbm [resolvable:$true] %s66_s26 }
  0x16   : > { %s75_s29 = scalar_lea.hbm %s962_s6, %s780_s16  ;;  %s475_s30 = sshra.s32 %s67_s26, 4  ;;  %s476_s30 = int_to_ptr.hbm [resolvable:$true] %s475_s30 }
  0x17   : > { %s477_s8 = scalar_lea.hbm %s476_s30, 1  ;;  %p480_p1 = scmp.lt.s32.totalorder %s476_s30, %s962_s6 }
  0x18   : > { %p478_p0 = scmp.ne.s32.totalorder %s476_s30, %s477_s8  ;;  %p481_p2 = scmp.lt.s32.totalorder %s803_s17, %s477_s8 }
  0x1a   : > { %p482_p3 = por %p481_p2, %p480_p1 }
  0x1c   : > { %p483_p4 = pnand %p482_p3, %p478_p0 }
  0x1e   : > { %486 = shalt.err (!%p483_p4)  }
  0x1f   : > { %s487_s16 = sshra.s32 %s778_s14, 4  ;;  %s711_s22 = smov [#allocation2]   ;;  %s488_s16 = int_to_ptr.vmem [resolvable:$true] %s487_s16 }
  0x20   : > { %s489_s21 = scalar_lea.vmem %s488_s16, 1  ;;  %s810_s23 = scalar_lea.vmem %s711_s22, 16 }
  0x21   : > { %p490_p5 = scmp.ne.s32.totalorder %s488_s16, %s489_s21  ;;  %p492_p6 = scmp.lt.s32.totalorder %s488_s16, [#allocation2] }
  0x22   : > { %p493_p7 = scmp.lt.s32.totalorder %s810_s23, %s489_s21 }
  0x24   : > { %p494_p8 = por %p493_p7, %p492_p6 }
  0x26   : > { %p495_p9 = pnand %p494_p8, %p490_p5 }
  0x28   : > { %498 = shalt.err (!%p495_p9)  }
  0x29   : > { %71 = dma.hbm_to_vmem [thread:$0]  %s67_s26, 16, %s778_s14, [#allocation3] }
  0x2a   : > { %s84_s24 = sshll.u32 %s75_s29, 4  ;;  %s93_s30 = scalar_lea.hbm %s962_s6, %s786_s20  ;;  %s85_s24 = int_to_ptr.hbm [resolvable:$true] %s84_s24 }
  0x2b   : > { %s818_s8 = sshll.u32 %s93_s30, 4  ;;  %s499_s9 = sshra.s32 %s85_s24, 4  ;;  %s500_s9 = int_to_ptr.hbm [resolvable:$true] %s499_s9  ;;  %s103_s8 = int_to_ptr.hbm [resolvable:$true] %s818_s8 }
  0x2c   : > { %s501_s15 = scalar_lea.hbm %s500_s9, 1  ;;  %p504_p11 = scmp.lt.s32.totalorder %s500_s9, %s962_s6 }
  0x2d   : > { %p502_p10 = scmp.ne.s32.totalorder %s500_s9, %s501_s15  ;;  %p505_p12 = scmp.lt.s32.totalorder %s803_s17, %s501_s15 }
  0x2f   : > { %p506_p13 = por %p505_p12, %p504_p11 }
  0x31   : > { %p507_p0 = pnand %p506_p13, %p502_p10 }
  0x33   : > { %510 = shalt.err (!%p507_p0)  }
  0x34   : > { %s511_s14 = sshra.s32 %s87_s19, 4  ;;  %s512_s14 = int_to_ptr.vmem [resolvable:$true] %s511_s14 }
  0x35   : > { %s513_s20 = scalar_lea.vmem %s512_s14, 1  ;;  %p516_p2 = scmp.lt.s32.totalorder %s512_s14, [#allocation2] }
  0x36   : > { %p514_p1 = scmp.ne.s32.totalorder %s512_s14, %s513_s20  ;;  %p517_p3 = scmp.lt.s32.totalorder %s810_s23, %s513_s20 }
  0x38   : > { %p518_p4 = por %p517_p3, %p516_p2 }
  0x3a   : > { %p519_p5 = pnand %p518_p4, %p514_p1 }
  0x3c   : > { %522 = shalt.err (!%p519_p5)  }
  0x3d   : > { %89 = dma.hbm_to_vmem [thread:$0]  %s85_s24, 16, %s87_s19, [#allocation3] }
  0x3e   : > { %s108_s26 = sadd.s32 3, %s770_s3  ;;  %s523_s29 = sshra.s32 %s103_s8, 4  ;;  %s524_s29 = int_to_ptr.hbm [resolvable:$true] %s523_s29 }
  0x3f   : > { %s525_s16 = scalar_lea.hbm %s524_s29, 1  ;;  %p528_p7 = scmp.lt.s32.totalorder %s524_s29, %s962_s6 }
  0x40   : > { %p526_p6 = scmp.ne.s32.totalorder %s524_s29, %s525_s16  ;;  %p529_p8 = scmp.lt.s32.totalorder %s803_s17, %s525_s16 }
  0x42   : > { %p530_p9 = por %p529_p8, %p528_p7 }
  0x44   : > { %p531_p10 = pnand %p530_p9, %p526_p6 }
  0x46   : > { %534 = shalt.err (!%p531_p10)  }
  0x47   : > { %s535_s27 = sshra.s32 %s105_s25, 4  ;;  %s536_s27 = int_to_ptr.vmem [resolvable:$true] %s535_s27 }
  0x48   : > { %s537_s19 = scalar_lea.vmem %s536_s27, 1  ;;  %p540_p12 = scmp.lt.s32.totalorder %s536_s27, [#allocation2] }
  0x49   : > { %p538_p11 = scmp.ne.s32.totalorder %s536_s27, %s537_s19  ;;  %p541_p13 = scmp.lt.s32.totalorder %s810_s23, %s537_s19 }
  0x4b   : > { %p542_p0 = por %p541_p13, %p540_p12 }
  0x4d   : > { %p543_p1 = pnand %p542_p0, %p538_p11 }
  0x4f   : > { %546 = shalt.err (!%p543_p1)  }
  0x50   : > { %107 = dma.hbm_to_vmem [thread:$0]  %s103_s8, 16, %s105_s25, [#allocation3] }
  0x51   : > { %s110_s24 = sld [smem:[#allocation5 + %s108_s26]]  ;;  %s371_s28 = scalar_lea.vmem %s774_s13, 3 [#allocation2] }
  0x52   : > { %s841_s30 = sshll.u32 %s371_s28, 4  ;;  %s126_s9 = sadd.s32 4, %s770_s3  ;;  %s123_s30 = int_to_ptr.vmem [resolvable:$true] %s841_s30 }
  0x53   : > { %s845_s15 = sld [smem:[#allocation5 + %s126_s9]]  ;;  %s375_s12 = scalar_lea.vmem %s774_s13, 4 [#allocation2] }
  0x54   : > { %s144_s18 = sadd.s32 5, %s770_s3  ;;  %s849_s14 = sshll.u32 %s375_s12, 4  ;;  %s141_s14 = int_to_ptr.vmem [resolvable:$true] %s849_s14 }
  0x55   : > { %s851_s20 = sld [smem:[#allocation5 + %s144_s18]]  ;;  %s379_s25 = scalar_lea.vmem %s774_s13, 5 [#allocation2] }
  0x56   : > { %s858_s16 = sshll.u32 %s379_s25, 4  ;;  %s159_s16 = int_to_ptr.vmem [resolvable:$true] %s858_s16 }
  0x57   : > { %s111_s29 = scalar_lea.hbm %s962_s6, %s110_s24 }
  0x58   : > { %s120_s21 = sshll.u32 %s111_s29, 4  ;;  %s121_s21 = int_to_ptr.hbm [resolvable:$true] %s120_s21 }
  0x59   : > { %s129_s19 = scalar_lea.hbm %s962_s6, %s845_s15  ;;  %s547_s28 = sshra.s32 %s121_s21, 4  ;;  %s548_s28 = int_to_ptr.hbm [resolvable:$true] %s547_s28 }
  0x5a   : > { %s549_s9 = scalar_lea.hbm %s548_s28, 1  ;;  %p552_p3 = scmp.lt.s32.totalorder %s548_s28, %s962_s6 }
  0x5b   : > { %p550_p2 = scmp.ne.s32.totalorder %s548_s28, %s549_s9  ;;  %p553_p4 = scmp.lt.s32.totalorder %s803_s17, %s549_s9 }
  0x5d   : > { %p554_p5 = por %p553_p4, %p552_p3 }
  0x5f   : > { %p555_p6 = pnand %p554_p5, %p550_p2 }
  0x61   : > { %558 = shalt.err (!%p555_p6)  }
  0x62   : > { %s559_s24 = sshra.s32 %s123_s30, 4  ;;  %s560_s24 = int_to_ptr.vmem [resolvable:$true] %s559_s24 }
  0x63   : > { %s561_s25 = scalar_lea.vmem %s560_s24, 1  ;;  %p564_p8 = scmp.lt.s32.totalorder %s560_s24, [#allocation2] }
  0x64   : > { %p562_p7 = scmp.ne.s32.totalorder %s560_s24, %s561_s25  ;;  %p565_p9 = scmp.lt.s32.totalorder %s810_s23, %s561_s25 }
  0x66   : > { %p566_p10 = por %p565_p9, %p564_p8 }
  0x68   : > { %p567_p11 = pnand %p566_p10, %p562_p7 }
  0x6a   : > { %570 = shalt.err (!%p567_p11)  }
  0x6b   : > { %125 = dma.hbm_to_vmem [thread:$0]  %s121_s21, 16, %s123_s30, [#allocation3] }
  0x6c   : > { %s138_s15 = sshll.u32 %s129_s19, 4  ;;  %s147_s29 = scalar_lea.hbm %s962_s6, %s851_s20  ;;  %s139_s15 = int_to_ptr.hbm [resolvable:$true] %s138_s15 }
  0x6d   : > { %s878_s22 = sshll.u32 %s147_s29, 4  ;;  %s571_s27 = sshra.s32 %s139_s15, 4  ;;  %s572_s27 = int_to_ptr.hbm [resolvable:$true] %s571_s27  ;;  %s157_s22 = int_to_ptr.hbm [resolvable:$true] %s878_s22 }
  0x6e   : > { %s573_s28 = scalar_lea.hbm %s572_s27, 1  ;;  %p576_p13 = scmp.lt.s32.totalorder %s572_s27, %s962_s6 }
  0x6f   : > { %p574_p12 = scmp.ne.s32.totalorder %s572_s27, %s573_s28  ;;  %p577_p0 = scmp.lt.s32.totalorder %s803_s17, %s573_s28 }
  0x71   : > { %p578_p1 = por %p577_p0, %p576_p13 }
  0x73   : > { %p579_p2 = pnand %p578_p1, %p574_p12 }
  0x75   : > { %582 = shalt.err (!%p579_p2)  }
  0x76   : > { %s583_s30 = sshra.s32 %s141_s14, 4  ;;  %s584_s30 = int_to_ptr.vmem [resolvable:$true] %s583_s30 }
  0x77   : > { %s585_s20 = scalar_lea.vmem %s584_s30, 1  ;;  %p588_p4 = scmp.lt.s32.totalorder %s584_s30, [#allocation2] }
  0x78   : > { %p586_p3 = scmp.ne.s32.totalorder %s584_s30, %s585_s20  ;;  %p589_p5 = scmp.lt.s32.totalorder %s810_s23, %s585_s20 }
  0x7a   : > { %p590_p6 = por %p589_p5, %p588_p4 }
  0x7c   : > { %p591_p7 = pnand %p590_p6, %p586_p3 }
  0x7e   : > { %594 = shalt.err (!%p591_p7)  }
  0x7f   : > { %143 = dma.hbm_to_vmem [thread:$0]  %s139_s15, 16, %s141_s14, [#allocation3] }
  0x80   : > { %s162_s21 = sadd.s32 6, %s770_s3  ;;  %s595_s19 = sshra.s32 %s157_s22, 4  ;;  %s596_s19 = int_to_ptr.hbm [resolvable:$true] %s595_s19 }
  0x81   : > { %s597_s18 = scalar_lea.hbm %s596_s19, 1  ;;  %p600_p9 = scmp.lt.s32.totalorder %s596_s19, %s962_s6 }
  0x82   : > { %p598_p8 = scmp.ne.s32.totalorder %s596_s19, %s597_s18  ;;  %p601_p10 = scmp.lt.s32.totalorder %s803_s17, %s597_s18 }
  0x84   : > { %p602_p11 = por %p601_p10, %p600_p9 }
  0x86   : > { %p603_p12 = pnand %p602_p11, %p598_p8 }
  0x88   : > { %606 = shalt.err (!%p603_p12)  }
  0x89   : > { %s607_s8 = sshra.s32 %s159_s16, 4  ;;  %s608_s8 = int_to_ptr.vmem [resolvable:$true] %s607_s8 }
  0x8a   : > { %s609_s14 = scalar_lea.vmem %s608_s8, 1  ;;  %p612_p0 = scmp.lt.s32.totalorder %s608_s8, [#allocation2] }
  0x8b   : > { %p610_p13 = scmp.ne.s32.totalorder %s608_s8, %s609_s14  ;;  %p613_p1 = scmp.lt.s32.totalorder %s810_s23, %s609_s14 }
  0x8d   : > { %p614_p2 = por %p613_p1, %p612_p0 }
  0x8f   : > { %p615_p3 = pnand %p614_p2, %p610_p13 }
  0x91   : > { %618 = shalt.err (!%p615_p3)  }
  0x92   : > { %161 = dma.hbm_to_vmem [thread:$0]  %s157_s22, 16, %s159_s16, [#allocation3] }
  0x93   : > { %s164_s15 = sld [smem:[#allocation5 + %s162_s21]]  ;;  %s383_s26 = scalar_lea.vmem %s774_s13, 6 [#allocation2] }
  0x94   : > { %s180_s29 = sadd.s32 7, %s770_s3  ;;  %s176_s28 = sshll.u32 %s383_s26, 4  ;;  %s177_s28 = int_to_ptr.vmem [resolvable:$true] %s176_s28 }
  0x95   : > { %s902_s27 = sld [smem:[#allocation5 + %s180_s29]]  ;;  %s387_s9 = scalar_lea.vmem %s774_s13, 7 [#allocation2] }
  0x96   : > { %s905_s12 = sshll.u32 %s387_s9, 4  ;;  %s195_s12 = int_to_ptr.vmem [resolvable:$true] %s905_s12 }
  0x99   : > { %s165_s19 = scalar_lea.hbm %s962_s6, %s164_s15 }
  0x9a   : > { %s174_s18 = sshll.u32 %s165_s19, 4  ;;  %s175_s18 = int_to_ptr.hbm [resolvable:$true] %s174_s18 }
  0x9b   : > { %s183_s3 = scalar_lea.hbm %s962_s6, %s902_s27  ;;  %s619_s21 = sshra.s32 %s175_s18, 4  ;;  %s620_s21 = int_to_ptr.hbm [resolvable:$true] %s619_s21 }
  0x9c   : > { %s621_s24 = scalar_lea.hbm %s620_s21, 1  ;;  %p624_p5 = scmp.lt.s32.totalorder %s620_s21, %s962_s6 }
  0x9d   : > { %p622_p4 = scmp.ne.s32.totalorder %s620_s21, %s621_s24  ;;  %p625_p6 = scmp.lt.s32.totalorder %s803_s17, %s621_s24 }
  0x9f   : > { %p626_p7 = por %p625_p6, %p624_p5 }
  0xa1   : > { %p627_p8 = pnand %p626_p7, %p622_p4 }
  0xa3   : > { %630 = shalt.err (!%p627_p8)  }
  0xa4   : > { %s631_s8 = sshra.s32 %s177_s28, 4  ;;  %s632_s8 = int_to_ptr.vmem [resolvable:$true] %s631_s8 }
  0xa5   : > { %s633_s14 = scalar_lea.vmem %s632_s8, 1  ;;  %p636_p10 = scmp.lt.s32.totalorder %s632_s8, [#allocation2] }
  0xa6   : > { %p634_p9 = scmp.ne.s32.totalorder %s632_s8, %s633_s14  ;;  %p637_p11 = scmp.lt.s32.totalorder %s810_s23, %s633_s14 }
  0xa8   : > { %p638_p12 = por %p637_p11, %p636_p10 }
  0xaa   : > { %p639_p13 = pnand %p638_p12, %p634_p9 }
  0xac   : > { %642 = shalt.err (!%p639_p13)  }
  0xad   : > { %179 = dma.hbm_to_vmem [thread:$0]  %s175_s18, 16, %s177_s28, [#allocation3] }
  0xae   : > { %s192_s15 = sshll.u32 %s183_s3, 4  ;;  %s193_s15 = int_to_ptr.hbm [resolvable:$true] %s192_s15 }
  0xaf   : > { %s643_s26 = sshra.s32 %s193_s15, 4  ;;  %s644_s26 = int_to_ptr.hbm [resolvable:$true] %s643_s26 }
  0xb0   : > { %s645_s29 = scalar_lea.hbm %s644_s26, 1  ;;  %p648_p1 = scmp.lt.s32.totalorder %s644_s26, %s962_s6 }
  0xb1   : > { %p646_p0 = scmp.ne.s32.totalorder %s644_s26, %s645_s29  ;;  %p649_p2 = scmp.lt.s32.totalorder %s803_s17, %s645_s29 }
  0xb3   : > { %p650_p3 = por %p649_p2, %p648_p1 }
  0xb5   : > { %p651_p4 = pnand %p650_p3, %p646_p0 }
  0xb7   : > { %654 = shalt.err (!%p651_p4)  }
  0xb8   : > { %s655_s30 = sshra.s32 %s195_s12, 4  ;;  %s656_s30 = int_to_ptr.vmem [resolvable:$true] %s655_s30 }
  0xb9   : > { %s657_s28 = scalar_lea.vmem %s656_s30, 1  ;;  %p660_p6 = scmp.lt.s32.totalorder %s656_s30, [#allocation2] }
  0xba   : > { %p658_p5 = scmp.ne.s32.totalorder %s656_s30, %s657_s28  ;;  %p661_p7 = scmp.lt.s32.totalorder %s810_s23, %s657_s28 }
  0xbc   : > { %p662_p8 = por %p661_p7, %p660_p6 }
  0xbe   : > { %p663_p9 = pnand %p662_p8, %p658_p5 }
  0xc0   : > { %666 = shalt.err (!%p663_p9)  }
  0xc1   : > { %197 = dma.hbm_to_vmem [thread:$0]  %s193_s15, 16, %s195_s12, [#allocation3] }
  0xc2   : > { %s53_s0 = sadd.s32 1, %s705_s0  }
  0xc3   : > { %p50_p10 = scmp.ge.s32.totalorder %s53_s0, 2  }
  0xc4   :  { %v200_v0 = vld [vmem:[%s957_s1] sm:$0xff] (%p50_p10)  ;;  %vm244_vm0 = vcmask (%p50_p10), 1041408   ;;  %v712_v2 = vmov (%p50_p10), 0   ;;  %v236_v4 = vld [vmem:[#allocation6 + $0x40] sm:$0x3] (%p50_p10)  ;;  %v235_v5 = vld [vmem:[#allocation6 + $0x38] sm:$0xff] (%p50_p10)  ;;  %v198_v16 = vlaneseq (%p50_p10) }
  0xc5   :  { %52 = sbr.rel (!%p50_p10) target bundleno = 13 (0xd), region = 99  ;;  %v210_v1 = vld [vmem:[%s958_s2] sm:$0xff] (%p50_p10)  ;;  %431 = vset.pattern.permute.xlu0 (%p50_p10), %v712_v2  ;;  %432 = vset.pattern.permute.xlu1 (%p50_p10), %v712_v2  ;;  %v211_v7 = vld [vmem:[%s958_s2 + $0x8] sm:$0xff] (%p50_p10)  ;;  %v233_v8 = vld [vmem:[#allocation6 + $0x28] sm:$0xff] (%p50_p10)  ;;  %vm237_vm3 = vcmask (%p50_p10), 539648   ;;  %v713_v20 = vmov (%p50_p10), 0.0  }
  0xc6   :  { %v212_v3 = vadd.s32 (%p50_p10), 64, %v210_v1  ;;  %203 = vperm.xlu0 (%p50_p10), %431, %v200_v0   ;;  %403 = vmatpush.msk.msra.mxu0 (%p50_p10), %vm244_vm0, %v236_v4  ;;  %v234_v6 = vld [vmem:[#allocation6 + $0x30] sm:$0xff] (%p50_p10)  ;;  %v201_v9 = vld [vmem:[%s957_s1 + $0x8] sm:$0xff] (%p50_p10)  ;;  %v213_v10 = vadd.s32 (%p50_p10), 64, %v211_v7  ;;  %v232_v11 = vld [vmem:[#allocation6 + $0x20] sm:$0xff] (%p50_p10)  ;;  %v199_v17 = vand.u32 (%p50_p10), 127, %v198_v16 }
  0xc7   :  { %407 = vmatpush.msk.msra.mxu1 (%p50_p10), %vm244_vm0, %v236_v4  ;;  %v231_v12 = vld [vmem:[#allocation6 + $0x18] sm:$0xff] (%p50_p10)  ;;  %v230_v13 = vld [vmem:[#allocation6 + $0x10] sm:$0xff] (%p50_p10)  ;;  %v229_v14 = vld [vmem:[#allocation6 + $0x8] sm:$0xff] (%p50_p10) }
  0xc8   :  { %215 = vperm.xlu1 (%p50_p10), %432, %v212_v3   ;;  %256 = vmatpush.msra.mxu0 (%p50_p10), %v235_v5  ;;  %v228_v15 = vld [vmem:[#allocation6] sm:$0xff] (%p50_p10) }
  0xc9   :  { %408 = vmatpush.msra.mxu1 (%p50_p10), %v235_v5 }
  0xca   :  { %257 = vmatpush.msra.mxu0 %v234_v6 }
  0xcb   :  { %409 = vmatpush.msra.mxu1 %v234_v6 }
  0xcc   :  { %258 = vmatpush.msra.mxu0 %v233_v8 }
  0xcd   :  { %410 = vmatpush.msra.mxu1 %v233_v8 }
  0xce   :  { %206 = vperm.xlu0 %431, %v201_v9   ;;  %259 = vmatpush.msra.mxu0 %v232_v11 }
  0xcf   :  { %411 = vmatpush.msra.mxu1 %v232_v11 }
  0xd0   :  { %218 = vperm.xlu1 %432, %v213_v10   ;;  %260 = vmatpush.msra.mxu0 %v231_v12 }
  0xd1   :  { %412 = vmatpush.msra.mxu1 %v231_v12 }
  0xd2   :  { %261 = vmatpush.msra.mxu0 %v230_v13 }
  0xd3   :  { %413 = vmatpush.msra.mxu1 %v230_v13 }
  0xd4   :  { %262 = vmatpush.msra.mxu0 %v229_v14 }
  0xd5   :  { %414 = vmatpush.msra.mxu1 %v229_v14 }
  0xd6   :  { %263 = vmatpush.msra.mxu0 %v228_v15 }
  0xd7   :  { %415 = vmatpush.msra.mxu1 %v228_v15 }
 0x138   :  { %v204_v18 = vpop.permute.xlu0 %203 }
 0x139   :  { %vm208_vm1 = vcmp.eq.s32.totalorder %v199_v17, %v204_v18 }
 0x13a   :  { %v216_v19 = vpop.permute.xlu1 %215 }
 0x13b   :  { %vm220_vm2 = vcmp.eq.s32.totalorder %v199_v17, %v216_v19 }
 0x13c   :  { %vm222_vm4 = vmor %vm208_vm1, %vm220_vm2 }
 0x13d   :  { %v401_v21 = vsel %vm222_vm4, 1.0, %v713_v20 }
 0x13e   :  { %404 = vmatmul.msk.f32.vlgmr.msra.gmra.mxu0 %vm237_vm3, %v401_v21 }
 0x140   :  { %v207_v22 = vpop.permute.xlu0 %206 }
 0x141   :  { %vm209_vm5 = vcmp.eq.s32.totalorder %v199_v17, %v207_v22 }
 0x142   :  { %v219_v23 = vpop.permute.xlu1 %218 }
 0x143   :  { %vm221_vm6 = vcmp.eq.s32.totalorder %v199_v17, %v219_v23 }
 0x144   :  { %vm223_vm7 = vmor %vm209_vm5, %vm221_vm6 }
 0x145   :  { %v402_v24 = vsel %vm223_vm7, 1.0, %v713_v20 }
 0x146   :  { %405 = vmatmul.msk.f32.vlgmr.msra.gmra.mxu1 %vm237_vm3, %v402_v24 }
 0x1bb   :  { %v265_v25 = vpop.f32.mrf.mxu0 }
 0x1c3   :  { %v268_v26 = vpop.f32.mrf.mxu1 }
 0x1c4   :  { %699 = dma.done.wait [#allocation3], 256 }
 0x1c5   :  { %700 = vsyncadd [#allocation3], 4294967040  ;;  %v274_v27 = vld [vmem:[#allocation2] sm:$0xff]  ;;  %v275_v29 = vld [vmem:[#allocation2 + $0x8] sm:$0xff]  ;;  %s714_s3 = smov [#allocation9]   ;;  %s338_s13 = sshll.u32 %s963_s7, 4  ;;  %s339_s13 = int_to_ptr.hbm [resolvable:$true] %s338_s13 }
 0x1c6   :  { %v276_v28 = vadd.f32 %v274_v27, %v265_v25  ;;  %v277_v30 = vadd.f32 %v275_v29, %v268_v26  ;;  %v433_v53 = vld [vmem:[%s960_s4] ss:$0 sm:$0xff]  ;;  %s336_s4 = sshll.u32 %s714_s3, 4  ;;  %s337_s4 = int_to_ptr.vmem [resolvable:$true] %s336_s4 }
 0x1c7   :  { %v434_v57 = vld [vmem:[%s961_s5] ss:$0 sm:$0xff] }
 0x1c8   :  { %278 = vadd.xlane.f32.xlu0 %v276_v28 }
 0x1d0   :  { %280 = vadd.xlane.f32.xlu0 %v277_v30 }
 0x23b   :  { %v279_v31 = vpop.xlane.xlu0 %278 }
 0x23c   :  { %v282_v32 = vmul.f32 0.0078125, %v279_v31 }
 0x23e   :  { %v284_v33 = vsub.f32 %v276_v28, %v282_v32 }
 0x240   :  { %v286_v34 = vmul.f32 %v284_v33, %v284_v33 }
 0x242   :  { %288 = vadd.xlane.f32.xlu1 %v286_v34 }
 0x243   :  { %v281_v35 = vpop.xlane.xlu0 %280 }
 0x244   :  { %v283_v36 = vmul.f32 0.0078125, %v281_v35 }
 0x246   :  { %v285_v37 = vsub.f32 %v277_v30, %v283_v36 }
 0x248   :  { %v287_v38 = vmul.f32 %v285_v37, %v285_v37 }
 0x24a   :  { %290 = vadd.xlane.f32.xlu1 %v287_v38 }
 0x2b5   :  { %v289_v39 = vpop.xlane.xlu1 %288 }
 0x2b6   :  { %v292_v40 = vmul.f32 0.0078125, %v289_v39 }
 0x2b8   :  { %v294_v41 = vadd.f32 1e-12, %v292_v40 }
 0x2ba   :  { %435 = vrsqrt.f32 %v294_v41  ;;  %vm302_vm9 = vweird.f32 %v294_v41 }
 0x2bd   :  { %v291_v42 = vpop.xlane.xlu1 %290 }
 0x2be   :  { %v293_v43 = vmul.f32 0.0078125, %v291_v42 }
 0x2c0   :  { %v436_v44 = vpop.eup %435  ;;  %v295_v45 = vadd.f32 1e-12, %v293_v43 }
 0x2c1   :  { %v297_v46 = vmul.f32 %v436_v44, %v294_v41  ;;  %vm303_vm8 = vweird.f32 %v436_v44 }
 0x2c2   :  { %437 = vrsqrt.f32 %v295_v45  ;;  %vm304_vm10 = vmor %vm302_vm9, %vm303_vm8  ;;  %vm312_vm12 = vweird.f32 %v295_v45 }
 0x2c3   :  { %v298_v47 = vmul.f32 %v436_v44, %v297_v46 }
 0x2c5   :  { %v299_v48 = vmul.f32 0.5, %v298_v47 }
 0x2c7   :  { %v300_v49 = vsub.f32 1.5, %v299_v48 }
 0x2c8   :  { %v438_v50 = vpop.eup %437 }
 0x2c9   :  { %v301_v51 = vmul.f32 %v436_v44, %v300_v49  ;;  %v307_v52 = vmul.f32 %v438_v50, %v295_v45  ;;  %vm313_vm11 = vweird.f32 %v438_v50 }
 0x2ca   :  { %vm314_vm13 = vmor %vm312_vm12, %vm313_vm11 }
 0x2cb   :  { %v305_v54 = vsel %vm304_vm10, %v436_v44, %v301_v51  ;;  %v308_v55 = vmul.f32 %v438_v50, %v307_v52 }
 0x2cc   :  { %v316_v56 = vmul.f32 %v305_v54, %v284_v33 }
 0x2cd   :  { %v309_v58 = vmul.f32 0.5, %v308_v55 }
 0x2ce   :  { %v322_v59 = vmul.f32 %v433_v53, %v316_v56 }
 0x2cf   :  { %v310_v60 = vsub.f32 1.5, %v309_v58 }
 0x2d0   :  { %v328_v61 = vadd.f32 %v434_v57, %v322_v59 }
 0x2d1   :  { %v311_v62 = vmul.f32 %v438_v50, %v310_v60 }
 0x2d2   :  { %330 = vst [vmem:[#allocation9] sm:$0xff] %v328_v61 }
 0x2d3   :  { %v315_v63 = vsel %vm314_vm13, %v438_v50, %v311_v62 }
 0x2d4   :  { %v317_v0 = vmul.f32 %v315_v63, %v285_v37 }
 0x2d6   :  { %v323_v1 = vmul.f32 %v433_v53, %v317_v0 }
 0x2d8   :  { %v329_v2 = vadd.f32 %v434_v57, %v323_v1 }
 0x2da   :  { %331 = vst [vmem:[#allocation9 + $0x8] sm:$0xff] %v329_v2 }
 0x2db   :  { %344 = dma.vmem_to_hbm [thread:$0]  %s337_s4, 256, %s339_s13, [#allocation8], %s709_s10, %s709_s10, %s710_s11  }
 0x2dc   :  { %701 = dma.done.wait [#allocation8], 256  }
 0x2dd   :  { %702 = vsyncadd [#allocation8], 4294967040 }
 0x2de   :  { %349 = vsyncpa [#allocation7], 1 }
 0x2df   :  { %350 = vsyncpa [#allocation8], 1 }
 0x2e0   :  { %351 = vsyncmov [#allocation3] }
 0x2e3   :  { %s352_s5 = vpop.sfrf %351 }
 0x2e4   :  { %p406_p11 = scmp.ne.s32.totalorder %s352_s5, 0 }
 0x2e6   :  { %356 = shalt.err (%p406_p11)  }

</bundles_post_ra>
